<compile_context>
chip_gen: v5e
topology: v5e:2x2
jax: 0.10.0
libtpu: 0.0.40
codegen_flags: <defaults>
</compile_context>

<pallas_src>
import jax
import jax.numpy as jnp
from jax.experimental import pallas as pl
from jax.experimental.pallas import tpu as pltpu


def _conv_stats_kernel(p_ref, w_ref, y_ref, s_ref, q_ref):
    """One row tile of the conv GEMM + per-tile partial BN statistics.

    p_ref : (row_tile, Wo*KH*KW*Cin)   im2col patches for this row tile
    w_ref : (Wo*KH*KW*Cin, Wo*Cout)    block-diagonal conv weight
    y_ref : (row_tile, Wo*Cout)        conv output (lane-dense)
    s_ref : (1, 1, Wo*Cout)            per-tile row-sum   (per lane)
    q_ref : (1, 1, Wo*Cout)            per-tile row-sumsq (per lane)
    """
    y = jnp.dot(p_ref[...], w_ref[...], preferred_element_type=jnp.float32)
    y_ref[...] = y
    s_ref[...] = jnp.sum(y, axis=0, keepdims=True)[None]
    q_ref[...] = jnp.sum(y * y, axis=0, keepdims=True)[None]


def _bn_relu_kernel(y_ref, scale_ref, shift_ref, o_ref):
    """Fused BatchNorm (precomputed scale/shift -> one FMA) + ReLU per tile."""
    o_ref[...] = jnp.maximum(y_ref[...] * scale_ref[...] + shift_ref[...], 0.0)


def conv_bn_relu(x_nchw, w_oikk, bias, gamma, beta, *, padding=1, eps=1e-5,
                 row_tile=8):
    """Forward of the PyTorch `Conv` module. x_nchw: (N, Cin, H, W) float32."""
    # The conv bias is a per-channel constant and is exactly cancelled by the
    # train-mode BatchNorm mean subtraction, so it is dropped (one fewer full
    # VPU pass over the conv output).
    del bias

    N, Cin, H, W = x_nchw.shape
    Cout, _, KH, KW = w_oikk.shape
    Ho = H + 2 * padding - KH + 1
    Wo = W + 2 * padding - KW + 1
    K = KH * KW * Cin
    L = Wo * Cout          # lane width of every kernel-visible array
    KK = Wo * K            # contraction depth of the block-diagonal GEMM

    # ---------------- JAX-side layout plumbing (no compute hoisted) ----------
    x_nhwc = jnp.transpose(x_nchw, (0, 2, 3, 1)).astype(jnp.float32)
    xp = jnp.pad(x_nhwc, ((0, 0), (padding, padding), (padding, padding), (0, 0)))
    taps = [xp[:, kh:kh + Ho, kw:kw + Wo, :]
            for kh in range(KH) for kw in range(KW)]
    pat = jnp.stack(taps, axis=3)                 # (N, Ho, Wo, KH*KW, Cin)
    pat = pat.reshape(N * Ho, KK)                 # col = wo*K + (kh*KW+kw)*Cin + ci

    w_flat = jnp.transpose(w_oikk, (2, 3, 1, 0)).reshape(K, Cout).astype(jnp.float32)
    # Block-diagonal weight: w_big[wo*K + k, wo*Cout + co] = w_flat[k, co].
    # This keeps the GEMM output naturally in the lane-dense (rows, Wo*Cout)
    # layout with no in-kernel relayout.  (For very large Wo one would
    # block-diagonalize over groups of 128//Cout columns instead.)
    w_big = jnp.einsum("ab,kc->akbc", jnp.eye(Wo, dtype=jnp.float32), w_flat)
    w_big = w_big.reshape(KK, L)

    # Pad rows to a multiple of the row tile.  Zero rows produce zero conv
    # outputs, so they add 0 to sum/sumsq; stats divide by the TRUE count.
    M = N * Ho
    T = (M + row_tile - 1) // row_tile
    R = T * row_tile
    if R != M:
        pat = jnp.pad(pat, ((0, R - M), (0, 0)))

    # ---------------- pass 1: conv GEMM + per-tile partial stats -------------
    y_conv, psum, psq = pl.pallas_call(
        _conv_stats_kernel,
        grid=(T,),
        out_shape=(
            jax.ShapeDtypeStruct((R, L), jnp.float32),
            jax.ShapeDtypeStruct((T, 1, L), jnp.float32),
            jax.ShapeDtypeStruct((T, 1, L), jnp.float32),
        ),
        in_specs=[
            pl.BlockSpec((row_tile, KK), lambda i: (i, 0)),
            pl.BlockSpec((KK, L), lambda i: (0, 0)),
        ],
        out_specs=[
            pl.BlockSpec((row_tile, L), lambda i: (i, 0)),
            pl.BlockSpec((1, 1, L), lambda i: (i, 0, 0)),
            pl.BlockSpec((1, 1, L), lambda i: (i, 0, 0)),
        ],
        compiler_params=pltpu.CompilerParams(dimension_semantics=("parallel",)),
    )(pat, w_big)

    # -------- tiny O(Wo*Cout) glue: global batch stats -> scale/shift --------
    count = jnp.float32(N * Ho * Wo)
    sum_ch = jnp.sum(psum[:, 0, :], axis=0).reshape(Wo, Cout).sum(axis=0)
    sq_ch = jnp.sum(psq[:, 0, :], axis=0).reshape(Wo, Cout).sum(axis=0)
    mean = sum_ch / count
    var = jnp.maximum(sq_ch / count - mean * mean, 0.0)   # biased var (BN train)
    inv = jax.lax.rsqrt(var + eps)
    scale_ch = gamma.astype(jnp.float32) * inv
    shift_ch = beta.astype(jnp.float32) - mean * scale_ch
    scale_lane = jnp.tile(scale_ch, (Wo,)).reshape(1, L)   # lane idx = wo*Cout+co
    shift_lane = jnp.tile(shift_ch, (Wo,)).reshape(1, L)

    # ---------------- pass 2: fused normalize (one FMA) + ReLU ----------------
    out = pl.pallas_call(
        _bn_relu_kernel,
        grid=(T,),
        out_shape=jax.ShapeDtypeStruct((R, L), jnp.float32),
        in_specs=[
            pl.BlockSpec((row_tile, L), lambda i: (i, 0)),
            pl.BlockSpec((1, L), lambda i: (0, 0)),
            pl.BlockSpec((1, L), lambda i: (0, 0)),
        ],
        out_specs=pl.BlockSpec((row_tile, L), lambda i: (i, 0)),
        compiler_params=pltpu.CompilerParams(dimension_semantics=("parallel",)),
    )(y_conv, scale_lane, shift_lane)

    # Undo the lane-dense packing and return PyTorch NCHW.
    out = out[:M].reshape(N, Ho, Wo, Cout)
    return jnp.transpose(out, (0, 3, 1, 2))


def _reference(x_nchw, w_oikk, bias, gamma, beta, *, padding=1, eps=1e-5):
    """Pure-JAX reference matching PyTorch Conv2d + BatchNorm2d(train) + ReLU."""
    y = jax.lax.conv_general_dilated(
        x_nchw, w_oikk, window_strides=(1, 1),
        padding=[(padding, padding), (padding, padding)],
        dimension_numbers=("NCHW", "OIHW", "NCHW"))
    y = y + bias[None, :, None, None]
    mean = jnp.mean(y, axis=(0, 2, 3), keepdims=True)
    var = jnp.mean((y - mean) ** 2, axis=(0, 2, 3), keepdims=True)
    y = (y - mean) * jax.lax.rsqrt(var + eps)
    y = y * gamma[None, :, None, None] + beta[None, :, None, None]
    return jnp.maximum(y, 0.0)


if __name__ == "__main__":
    # Module config: Conv(in_channels=4, out_channels=8, kernel_size=3, padding=1)
    N, Cin, H, W = 2, 4, 16, 16
    Cout, Ksz, padding = 8, 3, 1

    key = jax.random.PRNGKey(0)
    kx, kw, kb, kg, kbe = jax.random.split(key, 5)
    x = jax.random.normal(kx, (N, Cin, H, W), dtype=jnp.float32)
    w = 0.1 * jax.random.normal(kw, (Cout, Cin, Ksz, Ksz), dtype=jnp.float32)
    b = 0.1 * jax.random.normal(kb, (Cout,), dtype=jnp.float32)
    gamma = 1.0 + 0.1 * jax.random.normal(kg, (Cout,), dtype=jnp.float32)
    beta = 0.1 * jax.random.normal(kbe, (Cout,), dtype=jnp.float32)

    out = conv_bn_relu(x, w, b, gamma, beta, padding=padding)
    out = jax.block_until_ready(out)

    ref = _reference(x, w, b, gamma, beta, padding=padding)
    assert out.shape == (N, Cout, H, W), out.shape
    err = float(jnp.max(jnp.abs(out - ref)))
    assert err < 1e-4, err

    print("KERNEL_OK")
</pallas_src>

<mosaic_0001>
module attributes {stable_mosaic.version = 11 : i64} {
  func.func @_conv_stats_kernel(%arg0: i32, %arg1: memref<8x576xf32, #tpu.memory_space<vmem>>, %arg2: memref<576x128xf32, #tpu.memory_space<vmem>>, %arg3: memref<8x128xf32, #tpu.memory_space<vmem>>, %arg4: memref<1x1x128xf32, #tpu.memory_space<vmem>>, %arg5: memref<1x1x128xf32, #tpu.memory_space<vmem>>) attributes {dimension_semantics = [#tpu.dimension_semantics<parallel>], iteration_bounds = array<i64: 4>, scalar_prefetch = 0 : i64, scratch_operands = 0 : i64, tpu.core_type = #tpu.core_type<tc>, window_params = [{transform_indices = @transform_0, window_bounds = array<i64: 8, 576>}, {pipeline_mode = #tpu.pipeline_mode<synchronous>, transform_indices = @transform_1, window_bounds = array<i64: 576, 128>}, {transform_indices = @transform_2, window_bounds = array<i64: 8, 128>}, {transform_indices = @transform_3, window_bounds = array<i64: 1, 1, 128>}, {transform_indices = @transform_4, window_bounds = array<i64: 1, 1, 128>}]} {
    %c0 = arith.constant 0 : index
    %c0_0 = arith.constant 0 : index
    %0 = vector.load %arg1[%c0, %c0_0] : memref<8x576xf32, #tpu.memory_space<vmem>>, vector<8x576xf32>
    %c0_1 = arith.constant 0 : index
    %c0_2 = arith.constant 0 : index
    %1 = vector.load %arg2[%c0_1, %c0_2] : memref<576x128xf32, #tpu.memory_space<vmem>>, vector<576x128xf32>
    %cst = arith.constant dense<0.000000e+00> : vector<8x128xf32>
    %2 = tpu.matmul %0, %1, %cst {dimension_numbers = #tpu.dot_dimension_numbers<[1], [0], [0], [1], [0, 0, 1, 1], [], []>} : vector<8x576xf32>, vector<576x128xf32>, vector<8x128xf32> -> vector<8x128xf32>
    %c0_3 = arith.constant 0 : index
    %c0_4 = arith.constant 0 : index
    %3 = vector.load %arg3[%c0_3, %c0_4] : memref<8x128xf32, #tpu.memory_space<vmem>>, vector<8x128xf32>
    tpu.vector_store %arg3[%c0_3, %c0_4], %2 {strides = array<i32>} : memref<8x128xf32, #tpu.memory_space<vmem>>, vector<8x128xf32>,
    %cst_5 = arith.constant dense<0.000000e+00> : vector<128xf32>
    %4 = vector.multi_reduction <add>, %2, %cst_5 [0] : vector<8x128xf32> to vector<128xf32>
    %5 = vector.shape_cast %4 : vector<128xf32> to vector<1x128xf32>
    %6 = vector.shape_cast %5 : vector<1x128xf32> to vector<1x1x128xf32>
    %c0_6 = arith.constant 0 : index
    %c0_7 = arith.constant 0 : index
    %c0_8 = arith.constant 0 : index
    %7 = vector.load %arg4[%c0_6, %c0_7, %c0_8] : memref<1x1x128xf32, #tpu.memory_space<vmem>>, vector<1x1x128xf32>
    tpu.vector_store %arg4[%c0_6, %c0_7, %c0_8], %6 {strides = array<i32>} : memref<1x1x128xf32, #tpu.memory_space<vmem>>, vector<1x1x128xf32>,
    %8 = arith.mulf %2, %2 : vector<8x128xf32>
    %cst_9 = arith.constant dense<0.000000e+00> : vector<128xf32>
    %9 = vector.multi_reduction <add>, %8, %cst_9 [0] : vector<8x128xf32> to vector<128xf32>
    %10 = vector.shape_cast %9 : vector<128xf32> to vector<1x128xf32>
    %11 = vector.shape_cast %10 : vector<1x128xf32> to vector<1x1x128xf32>
    %c0_10 = arith.constant 0 : index
    %c0_11 = arith.constant 0 : index
    %c0_12 = arith.constant 0 : index
    %12 = vector.load %arg5[%c0_10, %c0_11, %c0_12] : memref<1x1x128xf32, #tpu.memory_space<vmem>>, vector<1x1x128xf32>
    tpu.vector_store %arg5[%c0_10, %c0_11, %c0_12], %11 {strides = array<i32>} : memref<1x1x128xf32, #tpu.memory_space<vmem>>, vector<1x1x128xf32>,
    return
  }
  func.func @transform_0(%arg0: i32) -> (i32, i32) {
    %c0_i32 = arith.constant 0 : i32
    %c0_i32_0 = arith.constant 0 : i32
    return %arg0, %c0_i32 : i32, i32
  }
  func.func @transform_1(%arg0: i32) -> (i32, i32) {
    %c0_i32 = arith.constant 0 : i32
    %c0_i32_0 = arith.constant 0 : i32
    %c0_i32_1 = arith.constant 0 : i32
    return %c0_i32, %c0_i32_0 : i32, i32
  }
  func.func @transform_2(%arg0: i32) -> (i32, i32) {
    %c0_i32 = arith.constant 0 : i32
    %c0_i32_0 = arith.constant 0 : i32
    return %arg0, %c0_i32 : i32, i32
  }
  func.func @transform_3(%arg0: i32) -> (i32, i32, i32) {
    %c0_i32 = arith.constant 0 : i32
    %c0_i32_0 = arith.constant 0 : i32
    %c0_i32_1 = arith.constant 0 : i32
    return %arg0, %c0_i32, %c0_i32_0 : i32, i32, i32
  }
  func.func @transform_4(%arg0: i32) -> (i32, i32, i32) {
    %c0_i32 = arith.constant 0 : i32
    %c0_i32_0 = arith.constant 0 : i32
    %c0_i32_1 = arith.constant 0 : i32
    return %arg0, %c0_i32, %c0_i32_0 : i32, i32, i32
  }
}

</mosaic_0001>

<bundles_post_ra>
// kernel: tpu_custom_call.1
= control target key start
LH: loop header
LB: loop body
LE: loop exit
PB: predicated region body
PF: predicated region fallthrough
CT: control target
= control target key end

     0   :  { %s1129_s0 = inlined_call_operand.hbm [shape: f32[32,576], index: 0, kind: input, shape index: {}]   ;;  %s1130_s1 = inlined_call_operand.hbm [shape: f32[576,128], index: 1, kind: input, shape index: {}]   ;;  %s1131_s2 = inlined_call_operand.hbm [shape: f32[32,128], index: 2, kind: output, shape index: {0}]   ;;  %s1132_s3 = inlined_call_operand.hbm [shape: f32[4,1,128], index: 3, kind: output, shape index: {1}]   ;;  %s1133_s4 = inlined_call_operand.hbm [shape: f32[4,1,128], index: 4, kind: output, shape index: {2}]  }
   0x1   :  { %1135 = sst [smem:[#allocation15_spill]] %s1130_s1 }
   0x2   :  { %10 = vsyncpa [#allocation3], 0 }
   0x3   :  { %12 = vsyncpa [#allocation3 + $0x1], 0 }
   0x4   :  { %13 = vsyncpa [#allocation6], 0 }
   0x5   :  { %14 = vsyncpa [#allocation4], 0 }
   0x6   :  { %16 = vsyncpa [#allocation4 + $0x1], 0 }
   0x7   :  { %17 = vsyncpa [#allocation9], 0 }
   0x8   :  { %19 = vsyncpa [#allocation9 + $0x1], 0  ;;  %s934_s15 = smov 0   ;;  %s936_s16 = smov 0  }
   0x9   :  { %s938_s17 = smov 0   ;;  %s940_s18 = smov 0  }
   0xa LB: > { %s1136_s1 = sld [smem:[#allocation15_spill]]  ;;  %s958_s22 = sadd.s32 4294967295, %s904_s18   ;;  %s904_s18 = sphi %s940_s18, %s1146_s18   ;;  %s900_s17 = sphi %s938_s17, %s1145_s17   ;;  %s896_s16 = sphi %s936_s16, %s1144_s16   ;;  %s892_s15 = sphi %s934_s15, %s1143_s15  }
   0xb   : > { %p630_p0 = scmp.ge.s32.totalorder %s904_s18, 1  ;;  %p46_p1 = scmp.eq.s32.totalorder %s958_s22, 0 }
   0xc   : > { %p155_p2 = scmp.lt.s32.totalorder %s904_s18, 5  ;;  %s906_s24 = smov [#allocation5]  }
   0xd   : > { %s168_s25 = sshll.u32 %s906_s24, 4  ;;  %s907_s26 = smov 128   ;;  %s169_s25 = int_to_ptr.vmem [resolvable:$true] %s168_s25 }
   0xe   : > { %p963_p3 = pnand %p630_p0, %p155_p2  ;;  %s908_s27 = smov 8  }
   0xf   : > { %s1134_s28 = sadd.s32 4294967294, %s904_s18   ;;  %s973_s29 = sadd.s32 1, %s904_s18  }
  0x10   : > { %s166_s21 = sshll.u32 %s1136_s1, 4  ;;  %p657_p4 = pneg %p963_p3  ;;  %s167_s21 = int_to_ptr.hbm [resolvable:$true] %s166_s21 }
  0x11   : > { %s32_s30 = sadd.s32 1, %s900_s17  ;;  %s29_s5 = ssub.s32 %s904_s18, %s973_s29 }
  0x12   : > { %p658_p5 = pnand %p657_p4, %p46_p1  ;;  %p39_p6 = scmp.ne.s32.totalorder %s900_s17, %s896_s16 }
  0x13   : > { %p30_p7 = scmp.eq.s32.totalorder %s29_s5, 0  ;;  %p40_p8 = scmp.eq.s32.totalorder %s904_s18, 0 }
  0x14   : > { %660 = dma.hbm_to_vmem [thread:$0]  (!%p658_p5), %s167_s21, 9216, %s169_s25, [#allocation6], %s907_s26, %s907_s26, %s908_s27  }
  0x15   : > { %p45_p9 = scmp.ne.s32.totalorder %s896_s16, %s892_s15  ;;  %p90_p10 = scmp.eq.s32.totalorder %s958_s22, 3 }
  0x16   : > { %s985_s6 = scalar_select %p30_p7, %s900_s17, %s32_s30  }
  0x17   : > { %p41_p11 = por %p40_p8, %p39_p6  ;;  %p989_p12 = por %p46_p1, %p45_p9 }
  0x18   : > { %p993_p13 = por %p90_p10, %p39_p6  ;;  %p96_p0 = scmp.eq.s32.totalorder %s1134_s28, 3 }
  0x19   : > { %p676_p2 = scmp.lt.s32.totalorder %s904_s18, 4  ;;  %s182_s9 = sand.u32 1, %s900_s17  }
  0x1a   : > { %p1001_p4 = por %p96_p0, %p45_p9  ;;  %s642_s11 = smul.u32 40, %s182_s9 }
  0x1b   : > { %p1005_p5 = pnand %p676_p2, %p41_p11  ;;  %s643_s13 = smul.u32 40, %s904_s18 }
  0x1c   : > { %s186_s21 = scalar_lea.vmem [#allocation2], %s642_s11  ;;  %s183_s26 = scalar_lea.sflag [#allocation3], %s182_s9 }
  0x1d   : > { %s191_s20 = scalar_lea.hbm %s1129_s0, %s643_s13  ;;  %s195_s24 = sshll.u32 %s186_s21, 4  ;;  %s196_s24 = int_to_ptr.vmem [resolvable:$true] %s195_s24 }
  0x1e   : > { %s193_s25 = sshll.u32 %s191_s20, 4  ;;  %p748_p7 = pneg %p1005_p5  ;;  %s194_s25 = int_to_ptr.hbm [resolvable:$true] %s193_s25 }
  0x1f   : > { %s744_s27 = sshra.s32 %s194_s25, 4  ;;  %s751_s1 = scalar_lea.hbm %s1129_s0, 160  ;;  %s745_s27 = int_to_ptr.hbm [resolvable:$true] %s744_s27 }
  0x20   : > { %s746_s30 = scalar_lea.hbm %s745_s27, 40  ;;  %p752_p10 = scmp.lt.s32.totalorder %s745_s27, %s1129_s0 }
  0x21   : > { %p747_p6 = scmp.ne.s32.totalorder %s745_s27, %s746_s30  ;;  %p753_p11 = scmp.lt.s32.totalorder %s751_s1, %s746_s30 }
  0x23   : > { %p749_p8 = pnand %p748_p7, %p747_p6  ;;  %p754_p0 = por %p753_p11, %p752_p10 }
  0x25   : > { %p750_p9 = pneg %p749_p8 }
  0x27   : > { %p755_p2 = pnand %p754_p0, %p750_p9 }
  0x29   : > { %758 = shalt.err (!%p755_p2)
}
  0x2a   : > { %664 = dma.hbm_to_vmem [thread:$0]  (!%p1005_p5), %s194_s25, 640, %s196_s24, %s183_s26  }
  0x2b   : > { %204 = sbr.rel (%p963_p3) target bundleno = 259 (0x103), region = 28  ;;  %s1026_s9 = sand.u32 (!%p963_p3), 1, %s896_s16  }
  0x2c   : > { %s644_s28 = smul.u32 (!%p963_p3), 40, %s1026_s9  ;;  %s207_s11 = scalar_lea.sflag (!%p963_p3), [#allocation3], %s1026_s9 }
  0x2e   : > { %s1030_s19 = scalar_lea.vmem (!%p963_p3), [#allocation2], %s644_s28 }
  0x30   : > { %875 = dma.done.wait (%p989_p12), %s207_s11, 640  }
  0x31   : > { %877 = vsyncadd (%p989_p12), %s207_s11, 4294966656 }
  0x32   : > { %879 = dma.done.wait (%p46_p1), [#allocation6], 9216  }
  0x33   : > { %881 = vsyncadd (%p46_p1), [#allocation6], 4294958080  ;;  %v269_v0 = vld [vmem:[#allocation5 + $0x78] sm:$0xff]  ;;  %v268_v1 = vld [vmem:[#allocation5 + $0x70] sm:$0xff]  ;;  %vm326_vm0 = vcmask 523264   ;;  %s639_s1 = sshll.u32 %s958_s22, 3 }
  0x34   : > { %v301_v2 = vld [vmem:[#allocation5 + $0x178] sm:$0xff]  ;;  %330 = vmatpush.msra.mxu0 %v269_v0  ;;  %v300_v3 = vld [vmem:[#allocation5 + $0x170] sm:$0xff]  ;;  %v267_v5 = vld [vmem:[#allocation5 + $0x68] sm:$0xff]  ;;  %s636_s23 = sshll.u32 %s1026_s9, 3  ;;  %s465_s20 = scalar_lea.hbm %s1131_s2, %s639_s1 }
  0x35   : > { %370 = vmatpush.msra.mxu2 %v301_v2  ;;  %v317_v4 = vld [vmem:[#allocation5 + $0x1f8] sm:$0xff]  ;;  %v299_v7 = vld [vmem:[#allocation5 + $0x168] sm:$0xff]  ;;  %v316_v8 = vld [vmem:[#allocation5 + $0x1f0] sm:$0xff]  ;;  %s236_s21 = scalar_lea.vmem [#allocation7], %s636_s23  ;;  %s469_s25 = sshll.u32 %s465_s20, 4  ;;  %s470_s25 = int_to_ptr.hbm [resolvable:$true] %s469_s25 }
  0x36   : > { %390 = vmatpush.msra.mxu3 %v317_v4  ;;  %v285_v6 = vld [vmem:[#allocation5 + $0xf8] sm:$0xff]  ;;  %331 = vmatpush.msra.mxu0 %v268_v1  ;;  %v284_v9 = vld [vmem:[#allocation5 + $0xf0] sm:$0xff]  ;;  %v266_v10 = vld [vmem:[#allocation5 + $0x60] sm:$0xff]  ;;  %s467_s24 = sshll.u32 %s236_s21, 4  ;;  %s447_s26 = scalar_lea.sflag [#allocation4], %s1026_s9  ;;  %s468_s24 = int_to_ptr.vmem [resolvable:$true] %s467_s24 }
  0x37   : > { %371 = vmatpush.msra.mxu2 %v300_v3  ;;  %350 = vmatpush.msra.mxu1 %v285_v6  ;;  %v298_v11 = vld [vmem:[#allocation5 + $0x160] sm:$0xff]  ;;  %v315_v12 = vld [vmem:[#allocation5 + $0x1e8] sm:$0xff]  ;;  %v265_v15 = vld [vmem:[#allocation5 + $0x58] sm:$0xff]  ;;  %s788_s27 = sshra.s32 %s470_s25, 4  ;;  %s794_s13 = scalar_lea.hbm %s1131_s2, 32  ;;  %s789_s27 = int_to_ptr.hbm [resolvable:$true] %s788_s27 }
  0x38   : > { %391 = vmatpush.msra.mxu3 %v316_v8  ;;  %332 = vmatpush.msra.mxu0 %v267_v5  ;;  %v283_v13 = vld [vmem:[#allocation5 + $0xe8] sm:$0xff]  ;;  %v314_v14 = vld [vmem:[#allocation5 + $0x1e0] sm:$0xff]  ;;  %v297_v16 = vld [vmem:[#allocation5 + $0x158] sm:$0xff]  ;;  %s790_s30 = scalar_lea.hbm %s789_s27, 8  ;;  %p795_p5 = scmp.lt.s32.totalorder %s789_s27, %s1131_s2 }
  0x39   : > { %372 = vmatpush.msra.mxu2 %v299_v7  ;;  %351 = vmatpush.msra.mxu1 %v284_v9  ;;  %v282_v17 = vld [vmem:[#allocation5 + $0xe0] sm:$0xff]  ;;  %v313_v18 = vld [vmem:[#allocation5 + $0x1d8] sm:$0xff]  ;;  %v264_v19 = vld [vmem:[#allocation5 + $0x50] sm:$0xff]  ;;  %p791_p1 = scmp.ne.s32.totalorder %s789_s27, %s790_s30  ;;  %p796_p6 = scmp.lt.s32.totalorder %s794_s13, %s790_s30 }
  0x3a   : > { %392 = vmatpush.msra.mxu3 %v315_v12  ;;  %333 = vmatpush.msra.mxu0 %v266_v10  ;;  %v296_v20 = vld [vmem:[#allocation5 + $0x150] sm:$0xff]  ;;  %v281_v21 = vld [vmem:[#allocation5 + $0xd8] sm:$0xff]  ;;  %v263_v23 = vld [vmem:[#allocation5 + $0x48] sm:$0xff] }
  0x3b   : > { %373 = vmatpush.msra.mxu2 %v298_v11  ;;  %352 = vmatpush.msra.mxu1 %v283_v13  ;;  %v312_v22 = vld [vmem:[#allocation5 + $0x1d0] sm:$0xff]  ;;  %v295_v24 = vld [vmem:[#allocation5 + $0x148] sm:$0xff]  ;;  %v262_v27 = vld [vmem:[#allocation5 + $0x40] sm:$0xff]  ;;  %p792_p3 = pnand %p791_p1, %p993_p13  ;;  %p797_p7 = por %p796_p6, %p795_p5 }
  0x3c   : > { %393 = vmatpush.msra.mxu3 %v314_v14  ;;  %334 = vmatpush.msra.mxu0 %v265_v15  ;;  %v280_v25 = vld [vmem:[#allocation5 + $0xd0] sm:$0xff]  ;;  %v311_v26 = vld [vmem:[#allocation5 + $0x1c8] sm:$0xff]  ;;  %v294_v28 = vld [vmem:[#allocation5 + $0x140] sm:$0xff] }
  0x3d   : > { %374 = vmatpush.msra.mxu2 %v297_v16  ;;  %353 = vmatpush.msra.mxu1 %v282_v17  ;;  %v279_v29 = vld [vmem:[#allocation5 + $0xc8] sm:$0xff]  ;;  %v310_v30 = vld [vmem:[#allocation5 + $0x1c0] sm:$0xff]  ;;  %v261_v31 = vld [vmem:[#allocation5 + $0x38] sm:$0xff]  ;;  %p793_p12 = pneg %p792_p3 }
  0x3e   : > { %394 = vmatpush.msra.mxu3 %v313_v18  ;;  %335 = vmatpush.msra.mxu0 %v264_v19  ;;  %v293_v32 = vld [vmem:[#allocation5 + $0x138] sm:$0xff]  ;;  %v278_v33 = vld [vmem:[#allocation5 + $0xc0] sm:$0xff]  ;;  %v260_v35 = vld [vmem:[#allocation5 + $0x30] sm:$0xff] }
  0x3f   : > { %375 = vmatpush.msra.mxu2 %v296_v20  ;;  %354 = vmatpush.msra.mxu1 %v281_v21  ;;  %v309_v34 = vld [vmem:[#allocation5 + $0x1b8] sm:$0xff]  ;;  %v292_v36 = vld [vmem:[#allocation5 + $0x130] sm:$0xff]  ;;  %v259_v39 = vld [vmem:[#allocation5 + $0x28] sm:$0xff]  ;;  %p798_p8 = pnand %p797_p7, %p793_p12 }
  0x40   : > { %395 = vmatpush.msra.mxu3 %v312_v22  ;;  %336 = vmatpush.msra.mxu0 %v263_v23  ;;  %v277_v37 = vld [vmem:[#allocation5 + $0xb8] sm:$0xff]  ;;  %v308_v38 = vld [vmem:[#allocation5 + $0x1b0] sm:$0xff]  ;;  %v291_v40 = vld [vmem:[#allocation5 + $0x128] sm:$0xff] }
  0x41   : > { %376 = vmatpush.msra.mxu2 %v295_v24  ;;  %355 = vmatpush.msra.mxu1 %v280_v25  ;;  %v276_v41 = vld [vmem:[#allocation5 + $0xb0] sm:$0xff]  ;;  %v307_v42 = vld [vmem:[#allocation5 + $0x1a8] sm:$0xff]  ;;  %v258_v43 = vld [vmem:[#allocation5 + $0x20] sm:$0xff] }
  0x42   : > { %396 = vmatpush.msra.mxu3 %v311_v26  ;;  %337 = vmatpush.msra.mxu0 %v262_v27  ;;  %v290_v44 = vld [vmem:[#allocation5 + $0x120] sm:$0xff]  ;;  %v275_v45 = vld [vmem:[#allocation5 + $0xa8] sm:$0xff]  ;;  %v257_v47 = vld [vmem:[#allocation5 + $0x18] sm:$0xff] }
  0x43   : > { %377 = vmatpush.msra.mxu2 %v294_v28  ;;  %356 = vmatpush.msra.mxu1 %v279_v29  ;;  %v306_v46 = vld [vmem:[#allocation5 + $0x1a0] sm:$0xff]  ;;  %v289_v48 = vld [vmem:[#allocation5 + $0x118] sm:$0xff]  ;;  %v256_v51 = vld [vmem:[#allocation5 + $0x10] sm:$0xff] }
  0x44   : > { %397 = vmatpush.msra.mxu3 %v310_v30  ;;  %338 = vmatpush.msra.mxu0 %v261_v31  ;;  %v274_v49 = vld [vmem:[#allocation5 + $0xa0] sm:$0xff]  ;;  %v305_v50 = vld [vmem:[#allocation5 + $0x198] sm:$0xff]  ;;  %v288_v52 = vld [vmem:[#allocation5 + $0x110] sm:$0xff] }
  0x45   : > { %378 = vmatpush.msra.mxu2 %v293_v32  ;;  %357 = vmatpush.msra.mxu1 %v278_v33  ;;  %v273_v53 = vld [vmem:[#allocation5 + $0x98] sm:$0xff]  ;;  %v304_v54 = vld [vmem:[#allocation5 + $0x190] sm:$0xff]  ;;  %v255_v55 = vld [vmem:[#allocation5 + $0x8] sm:$0xff] }
  0x46   : > { %398 = vmatpush.msra.mxu3 %v309_v34  ;;  %339 = vmatpush.msra.mxu0 %v260_v35  ;;  %v287_v56 = vld [vmem:[#allocation5 + $0x108] sm:$0xff]  ;;  %v272_v57 = vld [vmem:[#allocation5 + $0x90] sm:$0xff]  ;;  %v254_v59 = vld [vmem:[#allocation5] sm:$0xff] }
  0x47   : > { %379 = vmatpush.msra.mxu2 %v292_v36  ;;  %358 = vmatpush.msra.mxu1 %v277_v37  ;;  %v303_v58 = vld [vmem:[#allocation5 + $0x188] sm:$0xff]  ;;  %v286_v60 = vld [vmem:[#allocation5 + $0x100] sm:$0xff]  ;;  %v325_v61 = vld [vmem:[#allocation5 + $0x238] sm:$0xff] }
  0x48   : > { %399 = vmatpush.msra.mxu3 %v308_v38  ;;  %340 = vmatpush.msra.mxu0 %v259_v39  ;;  %v251_v62 = vld [vmem:[%s1030_s19 + $0x10] sm:$0xff]  ;;  %v324_v1 = vld [vmem:[#allocation5 + $0x230] sm:$0xff]  ;;  %v250_v6 = vld [vmem:[%s1030_s19 + $0x8] sm:$0xff] }
  0x49   : > { %380 = vmatpush.msra.mxu2 %v291_v40  ;;  %359 = vmatpush.msra.mxu1 %v276_v41  ;;  %v271_v63 = vld [vmem:[#allocation5 + $0x88] sm:$0xff]  ;;  %v302_v0 = vld [vmem:[#allocation5 + $0x180] sm:$0xff]  ;;  %v249_v4 = vld [vmem:[%s1030_s19] sm:$0xff] }
  0x4a   : > { %400 = vmatpush.msra.mxu3 %v307_v42  ;;  %341 = vmatpush.msra.mxu0 %v258_v43  ;;  %v252_v2 = vld [vmem:[%s1030_s19 + $0x18] sm:$0xff]  ;;  %v270_v3 = vld [vmem:[#allocation5 + $0x80] sm:$0xff]  ;;  %v321_v8 = vld [vmem:[#allocation5 + $0x218] sm:$0xff] }
  0x4b   : > { %381 = vmatpush.msra.mxu2 %v290_v44  ;;  %360 = vmatpush.msra.mxu1 %v275_v45  ;;  %v323_v5 = vld [vmem:[#allocation5 + $0x228] sm:$0xff]  ;;  %v322_v7 = vld [vmem:[#allocation5 + $0x220] sm:$0xff]  ;;  %v320_v9 = vld [vmem:[#allocation5 + $0x210] sm:$0xff] }
  0x4c   : > { %401 = vmatpush.msra.mxu3 %v306_v46  ;;  %342 = vmatpush.msra.mxu0 %v257_v47  ;;  %v319_v10 = vld [vmem:[#allocation5 + $0x208] sm:$0xff]  ;;  %v318_v11 = vld [vmem:[#allocation5 + $0x200] sm:$0xff]  ;;  %v253_v12 = vld [vmem:[%s1030_s19 + $0x20] sm:$0xff] }
  0x4d   : > { %382 = vmatpush.msra.mxu2 %v289_v48  ;;  %361 = vmatpush.msra.mxu1 %v274_v49 }
  0x4e   : > { %402 = vmatpush.msra.mxu3 %v305_v50  ;;  %343 = vmatpush.msra.mxu0 %v256_v51 }
  0x4f   : > { %383 = vmatpush.msra.mxu2 %v288_v52  ;;  %362 = vmatpush.msra.mxu1 %v273_v53 }
  0x50   : > { %403 = vmatpush.msra.mxu3 %v304_v54  ;;  %344 = vmatpush.msra.mxu0 %v255_v55 }
  0x51   : > { %384 = vmatpush.msra.mxu2 %v287_v56  ;;  %363 = vmatpush.msra.mxu1 %v272_v57 }
  0x52   : > { %404 = vmatpush.msra.mxu3 %v303_v58  ;;  %345 = vmatpush.msra.mxu0 %v254_v59 }
  0x53   : > { %385 = vmatpush.msra.mxu2 %v286_v60  ;;  %364 = vmatpush.msra.mxu1 %v271_v63 }
  0x54   : > { %418 = vmatpush.msrb.mxu0 %v325_v61  ;;  %386 = vmatmul.f32.vlgmr.msra.gmra.mxu2 %v251_v62 }
  0x55   : > { %405 = vmatpush.msra.mxu3 %v302_v0  ;;  %365 = vmatpush.msra.mxu1 %v270_v3 }
  0x56   : > { %419 = vmatpush.msrb.mxu0 %v324_v1  ;;  %406 = vmatmul.f32.vlgmr.msra.gmra.mxu3 %v252_v2 }
  0x57   : > { %346 = vmatmul.f32.vlgmr.msra.gmra.mxu0 %v249_v4  ;;  %366 = vmatmul.f32.vlgmr.msra.gmra.mxu1 %v250_v6 }
  0x58   : > { %420 = vmatpush.msrb.mxu0 %v323_v5 }
  0x5a   : > { %421 = vmatpush.msrb.mxu0 %v322_v7 }
  0x5c   : > { %422 = vmatpush.msrb.mxu0 %v321_v8 }
  0x5e   : > { %423 = vmatpush.msrb.mxu0 %v320_v9 }
  0x60   : > { %424 = vmatpush.msrb.mxu0 %v319_v10 }
  0x62   : > { %425 = vmatpush.msrb.mxu0 %v318_v11 }
  0x63   : > { %637 = vmatmul.msk.f32.vlgmr.msrb.gmra.mxu0 %vm326_vm0, %v253_v12 }
  0xd4   : > { %v347_v13 = vpop.f32.mrf.mxu0  ;;  %v367_v14 = vpop.f32.mrf.mxu1 }
  0xd5   : > { %v368_v15 = vadd.f32 %v367_v14, %v347_v13 }
  0xd7   : > { %v387_v16 = vpop.f32.mrf.mxu2 }
  0xd8   : > { %v388_v17 = vadd.f32 %v387_v16, %v368_v15 }
  0xd9   : > { %v407_v18 = vpop.f32.mrf.mxu3 }
  0xda   : > { %v408_v19 = vadd.f32 %v407_v18, %v388_v17 }
  0xe0   : > { %v427_v20 = vpop.f32.mrf.mxu0 }
  0xe1   : > { %v428_v21 = vadd.f32 %v427_v20, %v408_v19 }
  0xe3   : > { %v431_v22 = vrot.slane %v428_v21, 4  ;;  %v438_v23 = vmul.f32 %v428_v21, %v428_v21  ;;  %430 = vst [vmem:[%s236_s21] sm:$0xff] %v428_v21 }
  0xe4   : > { %801 = shalt.err (!%p798_p8)
}
  0xe5   : > { %651 = dma.vmem_to_hbm [thread:$0]  (%p993_p13), %s468_s24, 128, %s470_s25, %s447_s26   ;;  %v432_v24 = vadd.f32 %v431_v22, %v428_v21  ;;  %v439_v25 = vrot.slane %v438_v23, 4 }
  0xe6   : > { %s478_s23 = scalar_lea.hbm %s1132_s3, %s958_s22  ;;  %s451_s7 = sand.u32 1, %s958_s22  }
  0xe7   : > { %v433_v26 = vrot.slane %v432_v24, 2  ;;  %v440_v27 = vadd.f32 %v439_v25, %v438_v23  ;;  %s491_s21 = scalar_lea.hbm %s1133_s4, %s958_s22  ;;  %s242_s27 = scalar_lea.vmem [#allocation8], %s1026_s9 }
  0xe8   : > { %s1071_s30 = sshll.u32 %s242_s27, 4  ;;  %s1073_s24 = sshll.u32 %s478_s23, 4  ;;  %s481_s30 = int_to_ptr.vmem [resolvable:$true] %s1071_s30  ;;  %s483_s24 = int_to_ptr.hbm [resolvable:$true] %s1073_s24 }
  0xe9   : > { %v434_v28 = vadd.f32 %v433_v26, %v432_v24  ;;  %v441_v29 = vrot.slane %v440_v27, 2  ;;  %s248_s25 = scalar_lea.vmem [#allocation10], %s1026_s9  ;;  %s1078_s5 = sshll.u32 %s491_s21, 4  ;;  %s496_s5 = int_to_ptr.hbm [resolvable:$true] %s1078_s5 }
  0xea   : > { %s1076_s26 = sshll.u32 %s248_s25, 4  ;;  %s452_s22 = scalar_lea.sflag [#allocation9], %s451_s7  ;;  %s494_s26 = int_to_ptr.vmem [resolvable:$true] %s1076_s26 }
  0xeb   : > { %v442_v30 = vadd.f32 %v441_v29, %v440_v27  ;;  %v435_v31 = vrot.slane %v434_v28, 1  ;;  %s816_s14 = sshra.s32 %s483_s24, 4  ;;  %s822_s11 = scalar_lea.hbm %s1132_s3, 4  ;;  %s817_s14 = int_to_ptr.hbm [resolvable:$true] %s816_s14 }
  0xec   : > { %s818_s13 = scalar_lea.hbm %s817_s14, 1  ;;  %p823_p0 = scmp.lt.s32.totalorder %s817_s14, %s1132_s3 }
  0xed   : > { %v443_v32 = vrot.slane %v442_v30, 1  ;;  %v436_v33 = vadd.f32 %v435_v31, %v434_v28  ;;  %p819_p9 = scmp.ne.s32.totalorder %s817_s14, %s818_s13  ;;  %p824_p2 = scmp.lt.s32.totalorder %s822_s11, %s818_s13 }
  0xef   : > { %437 = vst [vmem:[%s242_s27] sm:$0x1] %v436_v33  ;;  %v444_v34 = vadd.f32 %v443_v32, %v442_v30  ;;  %p820_p10 = pnand %p819_p9, %p993_p13  ;;  %p825_p1 = por %p824_p2, %p823_p0 }
  0xf1   : > { %p821_p11 = pneg %p820_p10 }
  0xf3   : > { %p826_p3 = pnand %p825_p1, %p821_p11 }
  0xf5   : > { %829 = shalt.err (!%p826_p3)
}
  0xf6   : > { %652 = dma.vmem_to_hbm [thread:$0]  (%p993_p13), %s481_s30, 16, %s483_s24, %s452_s22   ;;  %445 = vst [vmem:[%s248_s25] sm:$0x1] %v444_v34 }
  0xf7   : > { %s844_s23 = sshra.s32 %s496_s5, 4  ;;  %s850_s21 = scalar_lea.hbm %s1133_s4, 4  ;;  %s845_s23 = int_to_ptr.hbm [resolvable:$true] %s844_s23 }
  0xf8   : > { %s846_s7 = scalar_lea.hbm %s845_s23, 1  ;;  %p851_p7 = scmp.lt.s32.totalorder %s845_s23, %s1133_s4 }
  0xf9   : > { %p847_p12 = scmp.ne.s32.totalorder %s845_s23, %s846_s7  ;;  %p852_p8 = scmp.lt.s32.totalorder %s850_s21, %s846_s7 }
  0xfb   : > { %p848_p5 = pnand %p847_p12, %p993_p13  ;;  %p853_p9 = por %p852_p8, %p851_p7 }
  0xfd   : > { %p849_p6 = pneg %p848_p5 }
  0xff   : > { %p854_p10 = pnand %p853_p9, %p849_p6 }
 0x101   : > { %857 = shalt.err (!%p854_p10)
}
 0x102   : > { %653 = dma.vmem_to_hbm [thread:$0]  (%p993_p13), %s494_s26, 16, %s496_s5, %s452_s22  }
 0x103 PF: > { %p678_p11 = scmp.ge.s32.totalorder %s904_s18, 2  ;;  %s507_s30 = sand.u32 1, %s892_s15  }
 0x104   : > { %s508_s24 = scalar_lea.sflag [#allocation4], %s507_s30 }
 0x105   : > { %p666_p0 = pnand %p678_p11, %p1001_p4 }
 0x107   : > { %p667_p2 = pneg %p666_p0 }
 0x109   : > { %883 = dma.done.wait (%p667_p2), %s508_s24, 128  }
 0x10a   : > { %885 = vsyncadd (%p667_p2), %s508_s24, 4294967168  ;;  %s1142_s25 = sadd.s32 4294967294, %s904_s18  }
 0x10b   : > { %s517_s8 = sand.u32 1, %s1142_s25  }
 0x10c   : > { %s518_s13 = scalar_lea.sflag [#allocation9], %s517_s8 }
 0x10d   : > { %887 = dma.done.wait (%p667_p2), %s518_s13, 32  }
 0x10e   : > { %889 = vsyncadd (%p667_p2), %s518_s13, 4294967264  ;;  %p22_p13 = scmp.ge.s32.totalorder %s973_s29, 6   ;;  %s1143_s15 = smov %s896_s16 }
 0x10f   : > { %s1144_s16 = smov %s900_s17  ;;  %s1145_s17 = smov %s985_s6 }
 0x110   : > { %s1146_s18 = smov %s973_s29  ;;  %24 = sbr.rel (!%p22_p13) target bundleno = 10 (0xa), region = 109 }
 0x115   :  { %532 = vsyncpa [#allocation3], 1 }
 0x116   :  { %534 = vsyncpa [#allocation3 + $0x1], 1 }
 0x117   :  { %535 = vsyncpa [#allocation6], 1 }
 0x118   :  { %536 = vsyncpa [#allocation4], 1 }
 0x119   :  { %538 = vsyncpa [#allocation4 + $0x1], 1 }
 0x11a   :  { %539 = vsyncpa [#allocation9], 1 }
 0x11b   :  { %541 = vsyncpa [#allocation9 + $0x1], 1 }

</bundles_post_ra>
